<compile_context>
chip_gen: v7x
topology: tpu7x:2x2x1
jax: 0.10.0
libtpu: 0.0.40
codegen_flags: <defaults>
</compile_context>

<pallas_src>
import functools
import math

import jax
import jax.numpy as jnp
from jax import lax
from jax.experimental import pallas as pl
from jax.experimental.pallas import tpu as pltpu

_HALO = 8  # left halo width in phase columns (sublane-aligned interior copy)


# ----------------------------- Pallas kernel --------------------------------
def _conv_relu_kernel(x_ref, w_ref, b_ref, o_ref, hp_ref, lhs_ref, *,
                      K, s, Ci, Co, Ho, Wo):
    """Fused Conv2d(K=2s-1, stride=s, padding=s-1) + bias + ReLU for one NHWC image.

    x_ref  : [1, Ho, s, Wo, s*Ci]   stride-phase view of the *unpadded* image:
             x_ref[0, i, a, j, b*Ci + c] == x[i*s + a, j*s + b, c]
    w_ref  : [K*K*Ci, Co]           HWIO weights flattened over (kh, kw, ci)
    b_ref  : [1, Co]                float32 bias
    o_ref  : [1, Ho*Wo, Co]         output rows ordered (oh, ow)
    hp_ref : [Ho+1, s, Wo+_HALO, s*Ci]  zero-halo phase buffer (VMEM scratch)
    lhs_ref: [Ho, Wo, K*K*Ci]       im2col slab (VMEM scratch)
    """
    # 1) in-kernel zero padding: zero the halo (top phase-row, left phase-cols), copy
    #    the image interior.  No padded activation copy ever touches HBM.
    hp_ref[0:1, :, :, :] = jnp.zeros((1, s, Wo + _HALO, s * Ci), hp_ref.dtype)
    hp_ref[:, :, 0:_HALO, :] = jnp.zeros((Ho + 1, s, _HALO, s * Ci), hp_ref.dtype)
    hp_ref[1:Ho + 1, :, _HALO:_HALO + Wo, :] = x_ref[0]

    # 2) fused im2col: assemble the [Ho, Wo, K*K*Ci] slab with 2 contiguous copies per
    #    kernel row (all kw taps of one phase-column group in a single slice).
    for kh in range(K):
        dh, a = (kh + 1) // s, (kh + 1) % s
        base = kh * K * Ci
        if s > 1:
            # taps kw = 0 .. s-2 : previous phase column, lanes [Ci, s*Ci)
            lhs_ref[:, :, base:base + (s - 1) * Ci] = (
                hp_ref[dh:dh + Ho, a, _HALO - 1:_HALO - 1 + Wo, Ci:s * Ci])
        # taps kw = s-1 .. K-1 : own phase column, lanes [0, s*Ci)
        lhs_ref[:, :, base + (s - 1) * Ci:base + K * Ci] = (
            hp_ref[dh:dh + Ho, a, _HALO:_HALO + Wo, 0:s * Ci])

    # 3) single folded MXU matmul (contraction depth K*K*Ci), f32 bias add, ReLU.
    lhs = lhs_ref[...].reshape(Ho * Wo, K * K * Ci)
    acc = jnp.dot(lhs, w_ref[...], preferred_element_type=jnp.float32)
    acc = jnp.maximum(acc + b_ref[...], 0.0)
    o_ref[...] = acc.reshape(1, Ho * Wo, Co).astype(o_ref.dtype)


# ------------------------------ conv layer -----------------------------------
def conv2d_relu_nhwc(x, w_hwio, bias, stride, compute_dtype=jnp.bfloat16):
    """PyTorch-semantics Conv2d(k=(st-1)*2+1, stride=st, padding=st-1) + ReLU (NHWC).

    x: [N, H, W, Ci], w_hwio: [K, K, Ci, Co], bias: [Co] -> [N, Ho, Wo, Co]."""
    N, H, W, Ci = x.shape
    K, _, _, Co = w_hwio.shape
    s = stride
    Ho = (H + 2 * (s - 1) - K) // s + 1   # == ceil(H / s)
    Wo = (W + 2 * (s - 1) - K) // s + 1
    M, KKCi = Ho * Wo, K * K * Ci

    xq = x.astype(compute_dtype)
    # Only when H/W are not multiples of the stride: tiny bottom/right zero pad so the
    # phase reshape below is exact (identical conv results -- that region is zero under
    # the conv's own padding anyway).  Skipped entirely for multiples of `s`.
    if (Ho * s, Wo * s) != (H, W):
        xq = jnp.pad(xq, ((0, 0), (0, Ho * s - H), (0, Wo * s - W), (0, 0)))
    # Free, metadata-only reshape into the stride-phase layout consumed by the kernel.
    xph = xq.reshape(N, Ho, s, Wo, s * Ci)

    wflat = w_hwio.reshape(KKCi, Co).astype(compute_dtype)
    b2 = bias.reshape(1, Co).astype(jnp.float32)

    itemsize = jnp.dtype(compute_dtype).itemsize
    bytes_accessed = (xph.size + wflat.size + N * M * Co) * itemsize + b2.size * 4

    out = pl.pallas_call(
        functools.partial(_conv_relu_kernel, K=K, s=s, Ci=Ci, Co=Co, Ho=Ho, Wo=Wo),
        out_shape=jax.ShapeDtypeStruct((N, M, Co), compute_dtype),
        grid=(N,),
        in_specs=[
            # one full image per grid step (phase layout, unpadded)
            pl.BlockSpec((1, Ho, s, Wo, s * Ci), lambda n: (n, 0, 0, 0, 0)),
            # weights / bias: constant index maps -> DMA'd once, kept resident
            pl.BlockSpec((KKCi, Co), lambda n: (0, 0)),
            pl.BlockSpec((1, Co), lambda n: (0, 0)),
        ],
        out_specs=pl.BlockSpec((1, M, Co), lambda n: (n, 0, 0)),
        scratch_shapes=[
            pltpu.VMEM((Ho + 1, s, Wo + _HALO, s * Ci), compute_dtype),
            pltpu.VMEM((Ho, Wo, KKCi), compute_dtype),
        ],
        compiler_params=pltpu.CompilerParams(
            dimension_semantics=("parallel",),
            # Cap, not a reservation (usage here is tiny).  Raised from the 32 MiB
            # default so larger images / row blocks fit on v5e/v6e (128 MiB physical)
            # while staying within v7x's 64 MiB physical VMEM.
            vmem_limit_bytes=64 * 1024 * 1024,
        ),
        cost_estimate=pl.CostEstimate(
            flops=2 * N * M * KKCi * Co,
            transcendentals=0,
            bytes_accessed=bytes_accessed),
    )(xph, wflat, b2)
    return out.reshape(N, Ho, Wo, Co)


def _area_resize_nhwc(x, size):
    """Plain-JAX glue for F.interpolate(mode='area') with integer scale factors (NHWC)."""
    N, H, W, C = x.shape
    h, w = size
    if H % h == 0 and W % w == 0:
        fh, fw = H // h, W // w
        return x.reshape(N, h, fh, w, fw, C).mean(axis=(2, 4))
    # TODO(synk): general fractional 'area' (adaptive average pool) resize not implemented.
    raise NotImplementedError("fractional area resize not supported")


# ------------------------------ module ---------------------------------------
class PatchConvPallas:
    """JAX/Pallas equivalent of PatchConv (stack of Conv2d((st-1)*2+1, st, st-1) + ReLU).

    External layout is NCHW like the PyTorch module; internally the stack runs NHWC/bf16
    with a single layout transpose at each module boundary."""

    def __init__(self, in_dim, dims, strides, key, compute_dtype=jnp.bfloat16):
        self.compute_dtype = compute_dtype
        self.params = []        # (w OIHW f32, b f32, stride) -- for the XLA reference
        self._fwd_params = []   # (w HWIO compute_dtype, b f32, stride) -- kernel-ready
        self.stride = 1
        idims = [in_dim] + list(dims[:-1])
        for idim, odim, st in zip(idims, dims, strides):
            k = (st - 1) * 2 + 1
            key, kw_, kb_ = jax.random.split(key, 3)
            fan_in = idim * k * k
            bound = 1.0 / math.sqrt(fan_in)   # PyTorch Conv2d default init range
            w = jax.random.uniform(kw_, (odim, idim, k, k), jnp.float32, -bound, bound)
            b = jax.random.uniform(kb_, (odim,), jnp.float32, -bound, bound)
            self.params.append((w, b, st))
            self._fwd_params.append(
                (jnp.transpose(w, (2, 3, 1, 0)).astype(compute_dtype), b, st))
            self.stride *= st

    def __call__(self, x, target_hw=None):
        x = jnp.transpose(x, (0, 2, 3, 1))              # NCHW -> NHWC (once)
        if target_hw is not None:
            th, tw = target_hw
            th, tw = th * self.stride, tw * self.stride
            if x.shape[1:3] != (th, tw):
                x = _area_resize_nhwc(x, (th, tw))
        for w_hwio, b, st in self._fwd_params:
            x = conv2d_relu_nhwc(x, w_hwio, b, st, self.compute_dtype)
        # NHWC -> NCHW (once), back to the PyTorch layout / dtype
        return jnp.transpose(x, (0, 3, 1, 2)).astype(jnp.float32)


# ------------------------------ reference ------------------------------------
def _ref_forward(x, params, compute_dtype=None):
    """XLA conv reference (NCHW, f32 out).  With `compute_dtype` set, mimic the Pallas
    model's mixed precision: bf16 operands, f32 accumulation, bf16 activations."""
    for w, b, st in params:
        pad = st - 1
        xin = x if compute_dtype is None else x.astype(compute_dtype)
        win = w if compute_dtype is None else w.astype(compute_dtype)
        y = lax.conv_general_dilated(
            xin, win, window_strides=(st, st),
            padding=((pad, pad), (pad, pad)),
            dimension_numbers=("NCHW", "OIHW", "NCHW"),
            preferred_element_type=jnp.float32)
        x = jax.nn.relu(y + b[None, :, None, None])
        if compute_dtype is not None:
            x = x.astype(compute_dtype).astype(jnp.float32)
    return x


# ------------------------------ main ------------------------------------------
if __name__ == "__main__":
    key = jax.random.PRNGKey(0)
    kx, kx2, kp = jax.random.split(key, 3)

    # small shapes consistent with the module: NCHW input, two stride-2 stages
    in_dim, dims, strides = 4, (8, 16), (2, 2)
    x = jax.random.normal(kx, (2, 4, 16, 16), jnp.float32)

    model = PatchConvPallas(in_dim, dims, strides, kp)

    out = jax.block_until_ready(model(x))                    # [2, 16, 4, 4]
    assert out.shape == (2, 16, 4, 4), out.shape

    # exact-math reference: bf16 operand rounding, f32 accumulation, bf16 activations
    ref_bf16 = jax.block_until_ready(
        _ref_forward(x, model.params, compute_dtype=model.compute_dtype))
    assert out.shape == ref_bf16.shape
    assert jnp.allclose(out, ref_bf16, atol=1e-2, rtol=1e-2), \
        "mismatch vs bf16-matched XLA conv reference"

    # sanity vs the full-f32 reference (difference = bf16 operand rounding only)
    ref_f32 = jax.block_until_ready(_ref_forward(x, model.params))
    assert jnp.allclose(out, ref_f32, atol=5e-2, rtol=5e-2), \
        "mismatch vs f32 XLA conv reference"

    # target_hw path (integer-factor 'area' resize) -- shape smoke test
    x_big = jax.random.normal(kx2, (2, 4, 32, 32), jnp.float32)
    out_big = jax.block_until_ready(model(x_big, target_hw=(4, 4)))
    assert out_big.shape == (2, 16, 4, 4), out_big.shape

    print("KERNEL_OK")
</pallas_src>

<mosaic_0001>
module attributes {stable_mosaic.version = 11 : i64} {
  func.func @_conv_relu_kernel(%arg0: i32, %arg1: memref<1x8x2x8x8xbf16, #tpu.memory_space<vmem>>, %arg2: memref<36x8xbf16, #tpu.memory_space<vmem>>, %arg3: memref<1x8xf32, #tpu.memory_space<vmem>>, %arg4: memref<1x64x8xbf16, #tpu.memory_space<vmem>>, %arg5: memref<9x2x16x8xbf16, #tpu.memory_space<vmem>>, %arg6: memref<8x8x36xbf16, #tpu.memory_space<vmem>>) attributes {dimension_semantics = [#tpu.dimension_semantics<parallel>], iteration_bounds = array<i64: 2>, scalar_prefetch = 0 : i64, scratch_operands = 2 : i64, tpu.core_type = #tpu.core_type<tc>, window_params = [{transform_indices = @transform_0, window_bounds = array<i64: 1, 8, 2, 8, 8>}, {pipeline_mode = #tpu.pipeline_mode<synchronous>, transform_indices = @transform_1, window_bounds = array<i64: 36, 8>}, {pipeline_mode = #tpu.pipeline_mode<synchronous>, transform_indices = @transform_2, window_bounds = array<i64: 1, 8>}, {transform_indices = @transform_3, window_bounds = array<i64: 1, 64, 8>}]} {
    %cst = arith.constant 0.000000e+00 : bf16
    %0 = vector.broadcast %cst : bf16 to vector<1x2x16x8xbf16>
    %c0 = arith.constant 0 : index
    %c0_0 = arith.constant 0 : index
    %c0_1 = arith.constant 0 : index
    %c0_2 = arith.constant 0 : index
    %1 = vector.load %arg5[%c0, %c0_0, %c0_1, %c0_2] : memref<9x2x16x8xbf16, #tpu.memory_space<vmem>>, vector<1x2x16x8xbf16>
    tpu.vector_store %arg5[%c0, %c0_0, %c0_1, %c0_2], %0 {strides = array<i32>} : memref<9x2x16x8xbf16, #tpu.memory_space<vmem>>, vector<1x2x16x8xbf16>,
    %cst_3 = arith.constant 0.000000e+00 : bf16
    %2 = vector.broadcast %cst_3 : bf16 to vector<9x2x8x8xbf16>
    %c0_4 = arith.constant 0 : index
    %c0_5 = arith.constant 0 : index
    %c0_6 = arith.constant 0 : index
    %c0_7 = arith.constant 0 : index
    %3 = vector.load %arg5[%c0_4, %c0_5, %c0_6, %c0_7] : memref<9x2x16x8xbf16, #tpu.memory_space<vmem>>, vector<9x2x8x8xbf16>
    tpu.vector_store %arg5[%c0_4, %c0_5, %c0_6, %c0_7], %2 {strides = array<i32>} : memref<9x2x16x8xbf16, #tpu.memory_space<vmem>>, vector<9x2x8x8xbf16>,
    %c0_8 = arith.constant 0 : index
    %c0_9 = arith.constant 0 : index
    %c0_10 = arith.constant 0 : index
    %c0_11 = arith.constant 0 : index
    %c0_12 = arith.constant 0 : index
    %4 = vector.load %arg1[%c0_8, %c0_9, %c0_10, %c0_11, %c0_12] : memref<1x8x2x8x8xbf16, #tpu.memory_space<vmem>>, vector<1x8x2x8x8xbf16>
    %5 = vector.shape_cast %4 : vector<1x8x2x8x8xbf16> to vector<8x2x8x8xbf16>
    %c1 = arith.constant 1 : index
    %c0_13 = arith.constant 0 : index
    %c8 = arith.constant 8 : index
    %c0_14 = arith.constant 0 : index
    %6 = vector.load %arg5[%c1, %c0_13, %c8, %c0_14] : memref<9x2x16x8xbf16, #tpu.memory_space<vmem>>, vector<8x2x8x8xbf16>
    tpu.vector_store %arg5[%c1, %c0_13, %c8, %c0_14], %5 {strides = array<i32>} : memref<9x2x16x8xbf16, #tpu.memory_space<vmem>>, vector<8x2x8x8xbf16>,
    %c0_15 = arith.constant 0 : index
    %c1_16 = arith.constant 1 : index
    %c7 = arith.constant 7 : index
    %c4 = arith.constant 4 : index
    %7 = vector.load %arg5[%c0_15, %c1_16, %c7, %c4] : memref<9x2x16x8xbf16, #tpu.memory_space<vmem>>, vector<8x1x8x4xbf16>
    %8 = vector.shape_cast %7 : vector<8x1x8x4xbf16> to vector<8x8x4xbf16>
    %c0_17 = arith.constant 0 : index
    %c0_18 = arith.constant 0 : index
    %c0_19 = arith.constant 0 : index
    %9 = vector.load %arg6[%c0_17, %c0_18, %c0_19] : memref<8x8x36xbf16, #tpu.memory_space<vmem>>, vector<8x8x4xbf16>
    tpu.vector_store %arg6[%c0_17, %c0_18, %c0_19], %8 {strides = array<i32>} : memref<8x8x36xbf16, #tpu.memory_space<vmem>>, vector<8x8x4xbf16>,
    %c0_20 = arith.constant 0 : index
    %c1_21 = arith.constant 1 : index
    %c8_22 = arith.constant 8 : index
    %c0_23 = arith.constant 0 : index
    %10 = vector.load %arg5[%c0_20, %c1_21, %c8_22, %c0_23] : memref<9x2x16x8xbf16, #tpu.memory_space<vmem>>, vector<8x1x8x8xbf16>
    %11 = vector.shape_cast %10 : vector<8x1x8x8xbf16> to vector<8x8x8xbf16>
    %c0_24 = arith.constant 0 : index
    %c0_25 = arith.constant 0 : index
    %c4_26 = arith.constant 4 : index
    %12 = vector.load %arg6[%c0_24, %c0_25, %c4_26] : memref<8x8x36xbf16, #tpu.memory_space<vmem>>, vector<8x8x8xbf16>
    tpu.vector_store %arg6[%c0_24, %c0_25, %c4_26], %11 {strides = array<i32>} : memref<8x8x36xbf16, #tpu.memory_space<vmem>>, vector<8x8x8xbf16>,
    %c1_27 = arith.constant 1 : index
    %c0_28 = arith.constant 0 : index
    %c7_29 = arith.constant 7 : index
    %c4_30 = arith.constant 4 : index
    %13 = vector.load %arg5[%c1_27, %c0_28, %c7_29, %c4_30] : memref<9x2x16x8xbf16, #tpu.memory_space<vmem>>, vector<8x1x8x4xbf16>
    %14 = vector.shape_cast %13 : vector<8x1x8x4xbf16> to vector<8x8x4xbf16>
    %c0_31 = arith.constant 0 : index
    %c0_32 = arith.constant 0 : index
    %c12 = arith.constant 12 : index
    %15 = vector.load %arg6[%c0_31, %c0_32, %c12] : memref<8x8x36xbf16, #tpu.memory_space<vmem>>, vector<8x8x4xbf16>
    tpu.vector_store %arg6[%c0_31, %c0_32, %c12], %14 {strides = array<i32>} : memref<8x8x36xbf16, #tpu.memory_space<vmem>>, vector<8x8x4xbf16>,
    %c1_33 = arith.constant 1 : index
    %c0_34 = arith.constant 0 : index
    %c8_35 = arith.constant 8 : index
    %c0_36 = arith.constant 0 : index
    %16 = vector.load %arg5[%c1_33, %c0_34, %c8_35, %c0_36] : memref<9x2x16x8xbf16, #tpu.memory_space<vmem>>, vector<8x1x8x8xbf16>
    %17 = vector.shape_cast %16 : vector<8x1x8x8xbf16> to vector<8x8x8xbf16>
    %c0_37 = arith.constant 0 : index
    %c0_38 = arith.constant 0 : index
    %c16 = arith.constant 16 : index
    %18 = vector.load %arg6[%c0_37, %c0_38, %c16] : memref<8x8x36xbf16, #tpu.memory_space<vmem>>, vector<8x8x8xbf16>
    tpu.vector_store %arg6[%c0_37, %c0_38, %c16], %17 {strides = array<i32>} : memref<8x8x36xbf16, #tpu.memory_space<vmem>>, vector<8x8x8xbf16>,
    %c1_39 = arith.constant 1 : index
    %c1_40 = arith.constant 1 : index
    %c7_41 = arith.constant 7 : index
    %c4_42 = arith.constant 4 : index
    %19 = vector.load %arg5[%c1_39, %c1_40, %c7_41, %c4_42] : memref<9x2x16x8xbf16, #tpu.memory_space<vmem>>, vector<8x1x8x4xbf16>
    %20 = vector.shape_cast %19 : vector<8x1x8x4xbf16> to vector<8x8x4xbf16>
    %c0_43 = arith.constant 0 : index
    %c0_44 = arith.constant 0 : index
    %c24 = arith.constant 24 : index
    %21 = vector.load %arg6[%c0_43, %c0_44, %c24] : memref<8x8x36xbf16, #tpu.memory_space<vmem>>, vector<8x8x4xbf16>
    tpu.vector_store %arg6[%c0_43, %c0_44, %c24], %20 {strides = array<i32>} : memref<8x8x36xbf16, #tpu.memory_space<vmem>>, vector<8x8x4xbf16>,
    %c1_45 = arith.constant 1 : index
    %c1_46 = arith.constant 1 : index
    %c8_47 = arith.constant 8 : index
    %c0_48 = arith.constant 0 : index
    %22 = vector.load %arg5[%c1_45, %c1_46, %c8_47, %c0_48] : memref<9x2x16x8xbf16, #tpu.memory_space<vmem>>, vector<8x1x8x8xbf16>
    %23 = vector.shape_cast %22 : vector<8x1x8x8xbf16> to vector<8x8x8xbf16>
    %c0_49 = arith.constant 0 : index
    %c0_50 = arith.constant 0 : index
    %c28 = arith.constant 28 : index
    %24 = vector.load %arg6[%c0_49, %c0_50, %c28] : memref<8x8x36xbf16, #tpu.memory_space<vmem>>, vector<8x8x8xbf16>
    tpu.vector_store %arg6[%c0_49, %c0_50, %c28], %23 {strides = array<i32>} : memref<8x8x36xbf16, #tpu.memory_space<vmem>>, vector<8x8x8xbf16>,
    %c0_51 = arith.constant 0 : index
    %c0_52 = arith.constant 0 : index
    %c0_53 = arith.constant 0 : index
    %25 = vector.load %arg6[%c0_51, %c0_52, %c0_53] : memref<8x8x36xbf16, #tpu.memory_space<vmem>>, vector<8x8x36xbf16>
    %26 = vector.shape_cast %25 : vector<8x8x36xbf16> to vector<64x36xbf16>
    %c0_54 = arith.constant 0 : index
    %c0_55 = arith.constant 0 : index
    %27 = vector.load %arg2[%c0_54, %c0_55] : memref<36x8xbf16, #tpu.memory_space<vmem>>, vector<36x8xbf16>
    %cst_56 = arith.constant dense<0.000000e+00> : vector<64x8xf32>
    %28 = tpu.matmul %26, %27, %cst_56 {dimension_numbers = #tpu.dot_dimension_numbers<[1], [0], [0], [1], [0, 0, 1, 1], [], []>} : vector<64x36xbf16>, vector<36x8xbf16>, vector<64x8xf32> -> vector<64x8xf32>
    %c0_57 = arith.constant 0 : index
    %c0_58 = arith.constant 0 : index
    %29 = vector.load %arg3[%c0_57, %c0_58] : memref<1x8xf32, #tpu.memory_space<vmem>>, vector<1x8xf32>
    %30 = vector.broadcast %29 : vector<1x8xf32> to vector<64x8xf32>
    %31 = arith.addf %28, %30 : vector<64x8xf32>
    %cst_59 = arith.constant 0.000000e+00 : f32
    %32 = vector.broadcast %cst_59 : f32 to vector<64x8xf32>
    %33 = arith.maximumf %31, %32 : vector<64x8xf32>
    %34 = vector.shape_cast %33 : vector<64x8xf32> to vector<1x64x8xf32>
    %35 = arith.truncf %34 : vector<1x64x8xf32> to vector<1x64x8xbf16>
    %c0_60 = arith.constant 0 : index
    %c0_61 = arith.constant 0 : index
    %c0_62 = arith.constant 0 : index
    %36 = vector.load %arg4[%c0_60, %c0_61, %c0_62] : memref<1x64x8xbf16, #tpu.memory_space<vmem>>, vector<1x64x8xbf16>
    tpu.vector_store %arg4[%c0_60, %c0_61, %c0_62], %35 {strides = array<i32>} : memref<1x64x8xbf16, #tpu.memory_space<vmem>>, vector<1x64x8xbf16>,
    return
  }
  func.func @transform_0(%arg0: i32) -> (i32, i32, i32, i32, i32) {
    %c0_i32 = arith.constant 0 : i32
    %c0_i32_0 = arith.constant 0 : i32
    %c0_i32_1 = arith.constant 0 : i32
    %c0_i32_2 = arith.constant 0 : i32
    %c0_i32_3 = arith.constant 0 : i32
    return %arg0, %c0_i32, %c0_i32_0, %c0_i32_1, %c0_i32_2 : i32, i32, i32, i32, i32
  }
  func.func @transform_1(%arg0: i32) -> (i32, i32) {
    %c0_i32 = arith.constant 0 : i32
    %c0_i32_0 = arith.constant 0 : i32
    %c0_i32_1 = arith.constant 0 : i32
    return %c0_i32, %c0_i32_0 : i32, i32
  }
  func.func @transform_2(%arg0: i32) -> (i32, i32) {
    %c0_i32 = arith.constant 0 : i32
    %c0_i32_0 = arith.constant 0 : i32
    %c0_i32_1 = arith.constant 0 : i32
    return %c0_i32, %c0_i32_0 : i32, i32
  }
  func.func @transform_3(%arg0: i32) -> (i32, i32, i32) {
    %c0_i32 = arith.constant 0 : i32
    %c0_i32_0 = arith.constant 0 : i32
    %c0_i32_1 = arith.constant 0 : i32
    return %arg0, %c0_i32, %c0_i32_0 : i32, i32, i32
  }
}

</mosaic_0001>

<bundles_post_ra>
// kernel: tpu_custom_call.1
= control target key start
LH: loop header
LB: loop body
LE: loop exit
PB: predicated region body
PF: predicated region fallthrough
CT: control target
= control target key end

     0   :  { %8 = vsyncpa [#allocation5], 0  ;;  %s2380_s0 = inlined_call_operand.hbm [shape: bf16[2,8,2,8,8], index: 0, kind: input, shape index: {}]   ;;  %s2381_s1 = inlined_call_operand.hbm [shape: bf16[36,8], index: 1, kind: input, shape index: {}]   ;;  %s2382_s2 = inlined_call_operand.hbm [shape: f32[1,8], index: 2, kind: input, shape index: {}]   ;;  %s2383_s3 = inlined_call_operand.hbm [shape: bf16[2,64,8], index: 3, kind: output, shape index: {}]  }
   0x1   :  { %10 = vsyncpa [#allocation5 + $0x1], 0 }
   0x2   :  { %11 = vsyncpa [#allocation8], 0 }
   0x3   :  { %12 = vsyncpa [#allocation6], 0 }
   0x4   :  { %14 = vsyncpa [#allocation6 + $0x1], 0  ;;  %s1936_s12 = smov 0   ;;  %s1938_s13 = smov 0  }
   0x5   :  { %s1940_s14 = smov 0   ;;  %s1942_s15 = smov 0  }
   0x6 LB: > { %s1957_s16 = sadd.s32 4294967295, %s1900_s15   ;;  %s1383_s17 = sadd.s32 4294967294, %s1900_s15   ;;  %s1900_s15 = sphi %s1942_s15, %s2405_s15   ;;  %s1896_s14 = sphi %s1940_s14, %s2404_s14   ;;  %s1892_s13 = sphi %s1938_s13, %s2403_s13   ;;  %s1888_s12 = sphi %s1936_s12, %s2402_s12  }
   0x7   : > { %p40_p0 = scmp.ne.s32.totalorder %s1892_s13, %s1888_s12  ;;  %p2384_p1 = scmp.eq.s32.totalorder %s1957_s16, 0 }
   0x8   : > { %p112_p3 = scmp.eq.s32.totalorder %s1383_s17, 1  ;;  %p1384_p5 = scmp.ge.s32.totalorder %s1900_s15, 1 }
   0x9   : > { %p1966_p4 = por %p2384_p1, %p40_p0  ;;  %p119_p7 = scmp.lt.s32.totalorder %s1900_s15, 3 }
   0xa   : > { %p1971_p6 = por %p112_p3, %p40_p0  ;;  %s1902_s21 = smov [#allocation7]  }
   0xb   : > { %s2387_s18 = scalar_select %p1966_p4, 1, 0 }
   0xc   : > { %s2388_s19 = scalar_select %p1971_p6, 1, 0 }
   0xd   : > { %p1976_p8 = pnand %p1384_p5, %p119_p7  ;;  %s131_s22 = sshll.u32 %s1902_s21, 4  ;;  %s1980_s22 = int_to_ptr.vmem [resolvable:$true] %s131_s22 }
   0xe   : > { %s1903_s24 = smov [#allocation9]   ;;  %s1744_s28 = scalar_lea.hbm %s2381_s1, 320 }
   0xf   : > { %p1584_p9 = pneg %p1976_p8  ;;  %s145_s25 = sshll.u32 %s1903_s24, 4  ;;  %s1991_s25 = int_to_ptr.vmem [resolvable:$true] %s145_s25 }
  0x10   : > { %p1745_p12 = scmp.ne.s32.totalorder %s2381_s1, %s1744_s28  ;;  %p1751_p5 = scmp.lt.u32.totalorder %s1744_s28, %s2381_s1 }
  0x11   : > { %p1987_p11 = pnand %p1584_p9, %p2384_p1 }
  0x13   : > { %p1746_p13 = pneg %p1987_p11 }
  0x15   : > { %p1747_p0 = pnand %p1746_p13, %p1745_p12 }
  0x17   : > { %p1748_p3 = pneg %p1747_p0 }
  0x19   : > { %p1753_p7 = pnand %p1751_p5, %p1748_p3 }
  0x1b   : > { %1756 = shalt.err (!%p1753_p7)
}
  0x1c   : > { %s1757_s6 = scalar_lea.vmem %s1980_s22, 320  ;;  %p1765_p2 = scmp.lt.s32.totalorder %s1980_s22, %s1980_s22 }
  0x1d   : > { %p1758_p9 = scmp.ne.s32.totalorder %s1980_s22, %s1757_s6  ;;  %p1766_p12 = scmp.lt.s32.totalorder %s1757_s6, %s1757_s6 }
  0x1f   : > { %p1760_p10 = pnand %p1758_p9, %p1746_p13  ;;  %p1767_p0 = por %p1766_p12, %p1765_p2 }
  0x21   : > { %p1761_p1 = pneg %p1760_p10 }
  0x23   : > { %p1768_p6 = pnand %p1767_p0, %p1761_p1 }
  0x25   : > { %1771 = shalt.err (!%p1768_p6)
}
  0x26   : > { %s1904_s7 = smov 64   ;;  %s1905_s8 = smov 4  }
  0x27   : > { %1587 = dma.hbm_to_vmem [thread:$0]  (!%p1987_p11), %s2381_s1, 320, %s1980_s22, [#allocation8], %s1904_s7, %s1904_s7, %s1905_s8  }
  0x28   : > { %s1772_s21 = scalar_lea.hbm %s2382_s2, 16 }
  0x29   : > { %p1773_p1 = scmp.ne.s32.totalorder %s2382_s2, %s1772_s21  ;;  %p1779_p10 = scmp.lt.u32.totalorder %s1772_s21, %s2382_s2 }
  0x2b   : > { %p1775_p2 = pnand %p1773_p1, %p1746_p13 }
  0x2d   : > { %p1776_p6 = pneg %p1775_p2 }
  0x2f   : > { %p1781_p3 = pnand %p1779_p10, %p1776_p6 }
  0x31   : > { %1784 = shalt.err (!%p1781_p3)
}
  0x32   : > { %s1785_s22 = scalar_lea.vmem %s1991_s25, 16  ;;  %s1792_s29 = scalar_lea.vmem %s1991_s25, 32 }
  0x33   : > { %p1786_p5 = scmp.ne.s32.totalorder %s1991_s25, %s1785_s22  ;;  %p1793_p12 = scmp.lt.s32.totalorder %s1991_s25, %s1991_s25 }
  0x34   : > { %p1794_p0 = scmp.lt.s32.totalorder %s1792_s29, %s1785_s22 }
  0x35   : > { %p1788_p7 = pnand %p1786_p5, %p1746_p13 }
  0x36   : > { %p1795_p1 = por %p1794_p0, %p1793_p12 }
  0x37   : > { %p1789_p9 = pneg %p1788_p7 }
  0x39   : > { %p1796_p2 = pnand %p1795_p1, %p1789_p9 }
  0x3b   : > { %1799 = shalt.err (!%p1796_p2)
}
  0x3c   : > { %1590 = dma.hbm_to_vmem [thread:$0]  (!%p1987_p11), %s2382_s2, 16, %s1991_s25, [#allocation8]  }
  0x3d   : > { %s2050_s5 = sadd.s32 1, %s1900_s15   ;;  %s27_s23 = sadd.s32 1, %s1896_s14 }
  0x3e   : > { %s24_s6 = ssub.s32 %s1900_s15, %s2050_s5  ;;  %p34_p13 = scmp.ne.s32.totalorder %s1896_s14, %s1892_s13 }
  0x3f   : > { %p25_p6 = scmp.eq.s32.totalorder %s24_s6, 0  ;;  %p35_p10 = scmp.eq.s32.totalorder %s1900_s15, 0 }
  0x40   : > { %p2391_p3 = scmp.eq.s32.totalorder %s1957_s16, 1  ;;  %p1601_p7 = scmp.lt.s32.totalorder %s1900_s15, 2 }
  0x41   : > { %s2066_s10 = scalar_select %p25_p6, %s1896_s14, %s27_s23  }
  0x42   : > { %p2060_p5 = por %p2391_p3, %p34_p13  ;;  %p36_p9 = por %p35_p10, %p34_p13 }
  0x43   : > { %s156_s11 = sand.u32 1, %s1896_s14   ;;  %s1533_s25 = sshll.u32 %s1900_s15, 10 }
  0x44   : > { %s2392_s9 = scalar_select %p2060_p5, 1, 0 }
  0x45   : > { %s1388_s17 = sshll.u32 %s156_s11, 6  ;;  %s2073_s26 = scalar_lea.hbm %s2380_s0, %s1533_s25 }
  0x46   : > { %s160_s27 = scalar_lea.vmem [#allocation4], %s1388_s17  ;;  %p2077_p11 = pnand %p1601_p7, %p36_p9 }
  0x47   : > { %s167_s28 = sshll.u32 %s160_s27, 4  ;;  %s2081_s29 = scalar_lea.sflag [#allocation5], %s156_s11  ;;  %s2075_s28 = int_to_ptr.vmem [resolvable:$true] %s167_s28 }
  0x48   : > { %s1800_s30 = scalar_lea.hbm %s2073_s26, 1024  ;;  %p1802_p0 = pneg %p2077_p11 }
  0x49   : > { %p1801_p12 = scmp.ne.s32.totalorder %s2073_s26, %s1800_s30  ;;  %s1805_s6 = scalar_lea.hbm %s2380_s0, 2048 }
  0x4a   : > { %p1806_p13 = scmp.lt.u32.totalorder %s2073_s26, %s2380_s0  ;;  %p1807_p6 = scmp.lt.u32.totalorder %s1805_s6, %s1800_s30 }
  0x4b   : > { %p1803_p1 = pnand %p1802_p0, %p1801_p12  ;;  %p1809_p3 = scmp.lt.u32.totalorder %s1800_s30, %s2073_s26 }
  0x4c   : > { %p1808_p10 = por %p1807_p6, %p1806_p13 }
  0x4d   : > { %p1804_p2 = pneg %p1803_p1 }
  0x4e   : > { %p1810_p7 = por %p1809_p3, %p1808_p10 }
  0x50   : > { %p1811_p9 = pnand %p1810_p7, %p1804_p2 }
  0x52   : > { %1814 = shalt.err (!%p1811_p9)
}
  0x53   : > { %s1815_s11 = scalar_lea.vmem %s2075_s28, 1024  ;;  %s1906_s21 = smov [#allocation4]  }
  0x54   : > { %p1816_p12 = scmp.ne.s32.totalorder %s2075_s28, %s1815_s11  ;;  %s1820_s24 = sshll.u32 %s1906_s21, 4  ;;  %s1821_s24 = int_to_ptr.vmem [resolvable:$false] %s1820_s24 }
  0x55   : > { %s1822_s27 = scalar_lea.vmem %s1821_s24, 2048  ;;  %p1823_p4 = scmp.lt.s32.totalorder %s2075_s28, %s1821_s24 }
  0x56   : > { %p1818_p1 = pnand %p1816_p12, %p1802_p0  ;;  %p1824_p13 = scmp.lt.s32.totalorder %s1822_s27, %s1815_s11 }
  0x58   : > { %p1819_p5 = pneg %p1818_p1  ;;  %p1825_p6 = por %p1824_p13, %p1823_p4 }
  0x5a   : > { %p1826_p10 = pnand %p1825_p6, %p1819_p5 }
  0x5c   : > { %1829 = shalt.err (!%p1826_p10)
}
  0x5d   : > { %1594 = dma.hbm_to_vmem [thread:$0]  (!%p2077_p11), %s2073_s26, 1024, %s2075_s28, %s2081_s29, %s1904_s7, %s1904_s7, %s1905_s8  }
  0x5e   : > { %179 = sbr.rel (%p1976_p8) target bundleno = 579 (0x243), region = 32  ;;  %s2115_s30 = sand.u32 (!%p1976_p8), 1, %s1892_s13  }
  0x5f   : > { %s1392_s4 = sshll.u32 (!%p1976_p8), %s2115_s30, 6  ;;  %s182_s23 = scalar_lea.sflag (!%p1976_p8), [#allocation5], %s2115_s30 }
  0x60   : > { %s2119_s6 = scalar_lea.vmem (!%p1976_p8), [#allocation4], %s1392_s4  ;;  %p2394_p4 = scmp.ne.s32.totalorder (!%p1976_p8), %s2387_s18, 0 }
  0x65   : > { %1875 = dma.done.wait (%p2394_p4), %s182_s23, 1024  }
  0x66   : > { %1877 = vsyncadd (%p2394_p4), %s182_s23, 4294966272  ;;  %p2395_p5 = scmp.eq.s32.totalorder %s1957_s16, 0 }
  0x68   : > { %1879 = dma.done.wait (%p2395_p5), [#allocation8], 336   ;;  %p2396_p8 = pmov %p2395_p5 }
  0x69   : > { %vm217_vm0 = vcmask 64512   ;;  %vm220_vm1 = vcmask 60416   ;;  %v1907_v0 = vmov 0   ;;  %vm386_vm2 = vsmask.f32 256  ;;  %s1908_s18 = smov 4  }
  0x6a   : > { %1881 = vsyncadd (%p2396_p8), [#allocation8], 4294966960  ;;  %219 = vst.msk [vmem:[#allocation2 + $0x8] sm:$0xff] %vm217_vm0, %v1907_v0  ;;  %vm387_vm3 = vsmask.f32 4368  ;;  %vm320_vm4 = vcmask 64516  }
  0x6b   : > { %223 = vst.msk [vmem:[#allocation2 + $0x10] sm:$0xf] %vm220_vm1, %v1907_v0  ;;  %224 = vst.msk [vmem:[#allocation2 + $0x18] sm:$0xf] %vm220_vm1, %v1907_v0  ;;  %v1652_v1 = vld [vmem:[%s2119_s6 + $0x4] ss:$0 sps:$4 sm:$0xff]  }
  0x6c   : > { %225 = vst.msk [vmem:[#allocation2 + $0x20] sm:$0xf] %vm220_vm1, %v1907_v0  ;;  %226 = vst.msk [vmem:[#allocation2 + $0x28] sm:$0xf] %vm220_vm1, %v1907_v0  ;;  %v1654_v3 = vld [vmem:[%s2119_s6 + $0x1c] ss:$0 sps:$4 sm:$0xff]  }
  0x6d   : > { %227 = vst.msk [vmem:[#allocation2 + $0x30] sm:$0xf] %vm220_vm1, %v1907_v0  ;;  %228 = vst.msk [vmem:[#allocation2 + $0x38] sm:$0xf] %vm220_vm1, %v1907_v0  ;;  %v1656_v5 = vld [vmem:[%s2119_s6 + $0x24] ss:$0 sps:$4 sm:$0xff]  }
  0x6e   : > { %229 = vst.msk [vmem:[#allocation2 + $0x40] sm:$0xf] %vm220_vm1, %v1907_v0  ;;  %230 = vst.msk [vmem:[#allocation2 + $0x48] sm:$0xf] %vm220_vm1, %v1907_v0  ;;  %v1658_v8 = vld [vmem:[%s2119_s6 + $0xc] ss:$0 sps:$4 sm:$0xff]  }
  0x6f   : > { %231 = vst.msk [vmem:[#allocation2 + $0x50] sm:$0xf] %vm220_vm1, %v1907_v0  ;;  %232 = vst.msk [vmem:[#allocation2 + $0x58] sm:$0xf] %vm220_vm1, %v1907_v0  ;;  %v1660_v9 = vld [vmem:[%s2119_s6 + $0x14] ss:$0 sps:$4 sm:$0xff]  }
  0x70   : > { %233 = vst.msk [vmem:[#allocation2 + $0x60] sm:$0xf] %vm220_vm1, %v1907_v0  ;;  %234 = vst.msk [vmem:[#allocation2 + $0x68] sm:$0xf] %vm220_vm1, %v1907_v0  ;;  %v1672_v10 = vld [vmem:[%s2119_s6 + $0x34] ss:$0 sps:$4 sm:$0xff]  }
  0x71   : > { %235 = vst.msk [vmem:[#allocation2 + $0x70] sm:$0xf] %vm220_vm1, %v1907_v0  ;;  %236 = vst.msk [vmem:[#allocation2 + $0x78] sm:$0xf] %vm220_vm1, %v1907_v0  ;;  %v1649_v2 = vld [vmem:[#allocation2 + $0xc] ss:$0 sps:$4 sm:$0xff]  }
  0x72   : > { %237 = vst.msk [vmem:[#allocation2 + $0x80] sm:$0xf] %vm220_vm1, %v1907_v0  ;;  %238 = vst.msk [vmem:[#allocation2 + $0x88] sm:$0xf] %vm220_vm1, %v1907_v0  ;;  %558 = vrot.lane.b32.xlu0 %v1649_v2, %s1908_s18  ;;  %v1675_v14 = vld [vmem:[%s2119_s6 + $0x2c] ss:$0 sps:$4 sm:$0xff]  }
  0x73   : > { %222 = vst.msk [vmem:[#allocation2 + $0x8] sm:$0xf] %vm220_vm1, %v1907_v0  ;;  %v1680_v15 = vld [vmem:[%s2119_s6 + $0x8] ss:$0 sps:$4 sm:$0xff]   ;;  %vm2163_vm5 = vmor %vm386_vm2, %vm387_vm3  ;;  %v1683_v19 = vld [vmem:[%s2119_s6] ss:$0 sps:$4 sm:$0xff]  }
  0x74   : > { %322 = vst.msk [vmem:[#allocation2 + $0x18] sm:$0xf0] %vm320_vm4, %v1652_v1  ;;  %328 = vst.msk [vmem:[#allocation2 + $0x48] sm:$0xf0] %vm320_vm4, %v1654_v3  ;;  %v1686_v20 = vld [vmem:[%s2119_s6 + $0x28] ss:$0 sps:$4 sm:$0xff]  }
  0x75   : > { %330 = vst.msk [vmem:[#allocation2 + $0x58] sm:$0xf0] %vm320_vm4, %v1656_v5  ;;  %324 = vst.msk [vmem:[#allocation2 + $0x28] sm:$0xf0] %vm320_vm4, %v1658_v8  ;;  %s1909_s20 = smov 124   ;;  %s1910_s7 = smov 8  }
  0x76   : > { %326 = vst.msk [vmem:[#allocation2 + $0x38] sm:$0xf0] %vm320_vm4, %v1660_v9  ;;  %334 = vst.msk [vmem:[#allocation2 + $0x78] sm:$0xf0] %vm320_vm4, %v1672_v10  ;;  %s1911_s8 = smov 16   ;;  %s1912_s26 = smov 20  }
  0x77   : > { %332 = vst.msk [vmem:[#allocation2 + $0x68] sm:$0xf0] %vm320_vm4, %v1675_v14  ;;  %323 = vst.msk [vmem:[#allocation2 + $0x20] sm:$0xf0] %vm320_vm4, %v1680_v15  ;;  %v1689_v14 = vld [vmem:[%s2119_s6 + $0x20] ss:$0 sps:$4 sm:$0xff]  }
  0x78   : > { %321 = vst.msk [vmem:[#allocation2 + $0x10] sm:$0xf0] %vm320_vm4, %v1683_v19  ;;  %331 = vst.msk [vmem:[#allocation2 + $0x60] sm:$0xf0] %vm320_vm4, %v1686_v20  ;;  %s1913_s28 = smov 28   ;;  %vm1160_vm6 = vcmask 1041408  }
  0x79   : > { %329 = vst.msk [vmem:[#allocation2 + $0x50] sm:$0xf0] %vm320_vm4, %v1689_v14  ;;  %vm517_vm7 = vcmask 27648   ;;  %vm582_vm8 = vcmask 93216   ;;  %vm767_vm9 = vcmask 126048   ;;  %vm832_vm10 = vcmask 191616  }
  0x7a   : > { %v338_v4 = vld [vmem:[#allocation2 + $0x8] sm:$0xf8]  ;;  %vm1018_vm11 = vcmask 224448   ;;  %vm1083_vm12 = vcmask 290016   ;;  %vm1147_vm13 = vcmask 293888   ;;  %s1395_s22 = sshll.u32 %s2115_s30, 5 }
  0x7b   : > { %v1412_v6 = vcombine.low %v338_v4, %v338_v4  ;;  %v1413_v7 = vcombine.high %v338_v4, %v338_v4  ;;  %v1653_v22 = vld [vmem:[#allocation2 + $0x1c] ss:$0 sps:$4 sm:$0xff]   ;;  %v342_v26 = vld [vmem:[#allocation2 + $0x48] sm:$0xf8]  ;;  %s215_s29 = scalar_lea.vmem [#allocation10], %s1395_s22  ;;  %s1542_s17 = sshll.u32 %s1957_s16, 9 }
  0x7c   : > { %v339_v23 = vld [vmem:[#allocation2 + $0x18] sm:$0xf8]  ;;  %560 = vrot.lane.b32.xlu1 %v1653_v22, %s1908_s18  ;;  %v1420_v29 = vcombine.low %v342_v26, %v342_v26  ;;  %v1421_v30 = vcombine.high %v342_v26, %v342_v26  ;;  %v1655_v32 = vld [vmem:[#allocation2 + $0x4c] ss:$0 sps:$4 sm:$0xff]   ;;  %s1291_s25 = sshll.u32 %s215_s29, 4  ;;  %s2330_s24 = scalar_lea.hbm %s2383_s3, %s1542_s17  ;;  %s2333_s25 = int_to_ptr.vmem [resolvable:$true] %s1291_s25 }
  0x7d   : > { %v390_v11 = vshrl.u32 %v1412_v6, 16  ;;  %v395_v12 = vshrl.u32 %v1413_v7, 16  ;;  %v398_v13 = vshll.u32 %v1413_v7, 16  ;;  %v1414_v24 = vcombine.low %v339_v23, %v339_v23  ;;  %v1657_v28 = vld [vmem:[#allocation2 + $0x5c] ss:$0 sps:$4 sm:$0xff]   ;;  %s1278_s16 = scalar_lea.sflag [#allocation6], %s2115_s30 }
  0x7e   : > { %v1415_v25 = vcombine.high %v339_v23, %v339_v23  ;;  %v343_v31 = vld [vmem:[#allocation2 + $0x58] sm:$0xf8]  ;;  %v442_v38 = vshrl.u32 %v1420_v29, 16  ;;  %v1659_v39 = vld [vmem:[#allocation2 + $0x2c] ss:$0 sps:$4 sm:$0xff]   ;;  %v447_v41 = vshrl.u32 %v1421_v30, 16 }
  0x7f   : > { %v1428_v17 = vrot.slane %v390_v11, 11  ;;  %v397_v18 = vrot.slane %v395_v12, 7  ;;  %v403_v33 = vshrl.u32 %v1414_v24, 16  ;;  %v1422_v35 = vcombine.low %v343_v31, %v343_v31  ;;  %v340_v43 = vld [vmem:[#allocation2 + $0x28] sm:$0xf8]  ;;  %s1830_s27 = scalar_lea.vmem %s2333_s25, 512 }
  0x80   : > { %v408_v34 = vshrl.u32 %v1415_v25, 16  ;;  %v1423_v36 = vcombine.high %v343_v31, %v343_v31  ;;  %v411_v37 = vshll.u32 %v1415_v25, 16  ;;  %v450_v42 = vshll.u32 %v1421_v30, 16  ;;  %568 = vrot.lane.b32.xlu1 %v1657_v28, %s1908_s18  ;;  %v1661_v44 = vld [vmem:[#allocation2 + $0x3c] ss:$0 sps:$4 sm:$0xff]   ;;  %p1831_p11 = scmp.ne.s32.totalorder %s2333_s25, %s1830_s27  ;;  %p2399_p0 = scmp.ne.s32.totalorder %s2392_s9, 0 }
  0x81   : > { %v400_v21 = vor.u32 %v398_v13, %v397_v18  ;;  %v1429_v45 = vrot.slane %v403_v33, 11  ;;  %v1416_v46 = vcombine.low %v340_v43, %v340_v43  ;;  %v1417_v47 = vcombine.high %v340_v43, %v340_v43  ;;  %v341_v49 = vld [vmem:[#allocation2 + $0x38] sm:$0xf8]  ;;  %v344_v7 = vld [vmem:[#allocation2 + $0x68] sm:$0xf8]  ;;  %s1914_s4 = smov [#allocation10]  }
  0x82   : > { %v410_v40 = vrot.slane %v408_v34, 7  ;;  %v455_v48 = vshrl.u32 %v1422_v35, 16  ;;  %v1432_v50 = vrot.slane %v442_v38, 11  ;;  %v449_v51 = vrot.slane %v447_v41, 7  ;;  %v345_v54 = vld [vmem:[#allocation2 + $0x78] sm:$0xf8]  ;;  %p1832_p2 = pnand %p1831_p11, %p2399_p0 }
  0x83   : > { %v401_v27 = vsel %vm2163_vm5, %v1428_v17, %v400_v21  ;;  %v460_v52 = vshrl.u32 %v1423_v36, 16  ;;  %v463_v53 = vshll.u32 %v1423_v36, 16  ;;  %v416_v56 = vshrl.u32 %v1416_v46, 16  ;;  %v592_v8 = vld [vmem:[#allocation2 + $0x20] sm:$0xf8]  ;;  %s1834_s23 = sshll.u32 %s1914_s4, 4  ;;  %s1835_s23 = int_to_ptr.vmem [resolvable:$false] %s1834_s23 }
  0x84   : > { %493 = vrot.lane.b32.xlu0 %v401_v27, %s1909_s20  ;;  %v413_v55 = vor.u32 %v411_v37, %v410_v40  ;;  %v421_v57 = vshrl.u32 %v1417_v47, 16  ;;  %v424_v58 = vshll.u32 %v1417_v47, 16  ;;  %v452_v59 = vor.u32 %v450_v42, %v449_v51  ;;  %564 = vrot.lane.b32.xlu1 %v1661_v44, %s1908_s18  ;;  %v591_v13 = vld [vmem:[#allocation2 + $0x10] sm:$0xf8]  ;;  %v1692_v24 = vld [vmem:[%s2119_s6 + $0x18] ss:$0 sps:$4 sm:$0xff]   ;;  %p1833_p3 = pneg %p1832_p2  ;;  %p1837_p7 = scmp.lt.s32.totalorder %s2333_s25, %s1835_s23 }
  0x85   : > { %v1433_v60 = vrot.slane %v455_v48, 11  ;;  %v462_v61 = vrot.slane %v460_v52, 7  ;;  %v1418_v62 = vcombine.low %v341_v49, %v341_v49  ;;  %v1430_v63 = vrot.slane %v416_v56, 11  ;;  %v1695_v29 = vld [vmem:[%s2119_s6 + $0x10] ss:$0 sps:$4 sm:$0xff]  }
  0x86   : > { %v423_v0 = vrot.slane %v421_v57, 7  ;;  %v1419_v1 = vcombine.high %v341_v49, %v341_v49  ;;  %v1426_v2 = vcombine.low %v345_v54, %v345_v54  ;;  %v453_v3 = vsel %vm2163_vm5, %v1432_v50, %v452_v59  ;;  %327 = vst.msk [vmem:[#allocation2 + $0x40] sm:$0xf0] %vm320_vm4, %v1692_v24  ;;  %v1698_v34 = vld [vmem:[%s2119_s6 + $0x38] ss:$0 sps:$4 sm:$0xff]  }
  0x87   : > { %v465_v4 = vor.u32 %v463_v53, %v462_v61  ;;  %v429_v5 = vshrl.u32 %v1418_v62, 16  ;;  %v1427_v6 = vcombine.high %v345_v54, %v345_v54  ;;  %v414_v9 = vsel %vm2163_vm5, %v1429_v45, %v413_v55  ;;  %325 = vst.msk [vmem:[#allocation2 + $0x30] sm:$0xf0] %vm320_vm4, %v1695_v29  ;;  %v1701_v38 = vld [vmem:[%s2119_s6 + $0x30] ss:$0 sps:$4 sm:$0xff]  }
  0x88   : > { %566 = vrot.lane.b32.xlu0 %v1655_v32, %s1908_s18  ;;  %v426_v10 = vor.u32 %v424_v58, %v423_v0  ;;  %v434_v11 = vshrl.u32 %v1419_v1, 16  ;;  %v437_v12 = vshll.u32 %v1419_v1, 16  ;;  %v481_v18 = vshrl.u32 %v1426_v2, 16  ;;  %501 = vrot.lane.b32.xlu1 %v453_v3, %s1909_s20  ;;  %v596_v43 = vld [vmem:[#allocation2 + $0x60] sm:$0xf8] }
  0x89   : > { %v466_v15 = vsel %vm2163_vm5, %v1433_v60, %v465_v4  ;;  %v1431_v17 = vrot.slane %v429_v5, 11  ;;  %v486_v19 = vshrl.u32 %v1427_v6, 16  ;;  %v489_v22 = vshll.u32 %v1427_v6, 16  ;;  %335 = vst.msk [vmem:[#allocation2 + $0x80] sm:$0xf0] %vm320_vm4, %v1698_v34 }
  0x8a   : > { %v427_v20 = vsel %vm2163_vm5, %v1430_v63, %v426_v10  ;;  %v436_v21 = vrot.slane %v434_v11, 7  ;;  %v1424_v23 = vcombine.low %v344_v7, %v344_v7  ;;  %v1425_v26 = vcombine.high %v344_v7, %v344_v7  ;;  %333 = vst.msk [vmem:[#allocation2 + $0x70] sm:$0xf0] %vm320_vm4, %v1701_v38  ;;  %v595_v54 = vld [vmem:[#allocation2 + $0x50] sm:$0xf8] }
  0x8b   : > { %v488_v25 = vrot.slane %v486_v19, 7  ;;  %v1446_v27 = vcombine.low %v592_v8, %v592_v8  ;;  %v1447_v28 = vcombine.high %v592_v8, %v592_v8  ;;  %v1444_v32 = vcombine.low %v591_v13, %v591_v13  ;;  %v1679_v56 = vld [vmem:[#allocation2 + $0x6c] ss:$0 sps:$4 sm:$0xff]   ;;  %v1678_v10 = vld [vmem:[#allocation2 + $0x7c] ss:$0 sps:$4 sm:$0xff]  }
  0x8c   : > { %562 = vrot.lane.b32.xlu0 %v1659_v39, %s1908_s18  ;;  %v439_v30 = vor.u32 %v437_v12, %v436_v21  ;;  %v468_v31 = vshrl.u32 %v1424_v23, 16  ;;  %v1445_v33 = vcombine.high %v591_v13, %v591_v13  ;;  %v1435_v35 = vrot.slane %v481_v18, 11  ;;  %503 = vrot.lane.b32.xlu1 %v466_v15, %s1909_s20  ;;  %v1731_v16 = vld [vmem:[#allocation2 + $0x6c] ss:$0 sps:$4 sm:$0xff]  }
  0x8d   : > { %v473_v36 = vshrl.u32 %v1425_v26, 16  ;;  %v476_v37 = vshll.u32 %v1425_v26, 16  ;;  %v491_v40 = vor.u32 %v489_v22, %v488_v25  ;;  %v653_v41 = vshrl.u32 %v1446_v27, 16  ;;  %v594_v0 = vld [vmem:[#allocation2 + $0x40] sm:$0xf8] }
  0x8e   : > { %v440_v39 = vsel %vm2163_vm5, %v1431_v17, %v439_v30  ;;  %v658_v42 = vshrl.u32 %v1447_v28, 16  ;;  %v1434_v44 = vrot.slane %v468_v31, 11  ;;  %v661_v46 = vshll.u32 %v1447_v28, 16  ;;  %v593_v5 = vld [vmem:[#allocation2 + $0x30] sm:$0xf8] }
  0x8f   : > { %v475_v45 = vrot.slane %v473_v36, 7  ;;  %v640_v47 = vshrl.u32 %v1444_v32, 16  ;;  %v645_v49 = vshrl.u32 %v1445_v33, 16  ;;  %v648_v50 = vshll.u32 %v1445_v33, 16 }
  0x90   : > { %495 = vrot.lane.b32.xlu0 %v414_v9, %s1909_s20  ;;  %v660_v48 = vrot.slane %v658_v42, 7  ;;  %v1454_v51 = vcombine.low %v596_v43, %v596_v43  ;;  %v1455_v53 = vcombine.high %v596_v43, %v596_v43  ;;  %499 = vrot.lane.b32.xlu1 %v440_v39, %s1909_s20  ;;  %v492_v55 = vsel %vm2163_vm5, %v1435_v35, %v491_v40  ;;  %v598_v18 = vld [vmem:[#allocation2 + $0x80] sm:$0xf8] }
  0x91   : > { %v478_v52 = vor.u32 %v476_v37, %v475_v45  ;;  %v1461_v57 = vrot.slane %v653_v41, 11  ;;  %v647_v58 = vrot.slane %v645_v49, 7  ;;  %v1452_v59 = vcombine.low %v595_v54, %v595_v54  ;;  %v597_v27 = vld [vmem:[#allocation2 + $0x70] sm:$0xf8] }
  0x92   : > { %v663_v61 = vor.u32 %v661_v46, %v660_v48  ;;  %v710_v62 = vshrl.u32 %v1455_v53, 16  ;;  %v1453_v63 = vcombine.high %v595_v54, %v595_v54  ;;  %v1460_v1 = vrot.slane %v640_v47, 11 }
  0x93   : > { %v479_v60 = vsel %vm2163_vm5, %v1434_v44, %v478_v52  ;;  %v650_v2 = vor.u32 %v648_v50, %v647_v58  ;;  %v705_v3 = vshrl.u32 %v1454_v51, 16  ;;  %v692_v4 = vshrl.u32 %v1452_v59, 16  ;;  %v1724_v50 = vld [vmem:[%s2119_s6 + $0x3c] ss:$0 sps:$4 sm:$0xff]   ;;  %v842_v58 = vld [vmem:[#allocation2 + $0x18] sm:$0xf8] }
  0x94   : > { %497 = vrot.lane.b32.xlu0 %v427_v20, %s1909_s20  ;;  %v712_v6 = vrot.slane %v710_v62, 7  ;;  %v713_v7 = vshll.u32 %v1455_v53, 16  ;;  %v697_v8 = vshrl.u32 %v1453_v63, 16  ;;  %v700_v9 = vshll.u32 %v1453_v63, 16  ;;  %507 = vrot.lane.b32.xlu1 %v492_v55, %s1909_s20  ;;  %336 = vst.msk [vmem:[#allocation2 + $0x88] sm:$0xf0] %vm320_vm4, %v1724_v50 }
  0x95   : > { %v1450_v11 = vcombine.low %v594_v0, %v594_v0  ;;  %v1451_v12 = vcombine.high %v594_v0, %v594_v0  ;;  %v1448_v13 = vcombine.low %v593_v5, %v593_v5  ;;  %v664_v14 = vsel %vm2163_vm5, %v1461_v57, %v663_v61  ;;  %v843_v61 = vld [vmem:[#allocation2 + $0x28] sm:$0xf8]  ;;  %v1705_v63 = vld [vmem:[#allocation2 + $0x14] ss:$0 sps:$4 sm:$0xff]   ;;  %v846_v0 = vld [vmem:[#allocation2 + $0x58] sm:$0xf8] }
  0x96   : > { %v699_v15 = vrot.slane %v697_v8, 7  ;;  %v1449_v17 = vcombine.high %v593_v5, %v593_v5  ;;  %v651_v19 = vsel %vm2163_vm5, %v1460_v1, %v650_v2  ;;  %v1465_v20 = vrot.slane %v705_v3, 11  ;;  %v1704_v1 = vld [vmem:[#allocation2 + $0x24] ss:$0 sps:$4 sm:$0xff]   ;;  %v847_v5 = vld [vmem:[#allocation2 + $0x68] sm:$0xf8] }
  0x97   : > { %v1464_v21 = vrot.slane %v692_v4, 11  ;;  %v684_v22 = vshrl.u32 %v1451_v12, 16  ;;  %v715_v23 = vor.u32 %v713_v7, %v712_v6  ;;  %v666_v25 = vshrl.u32 %v1448_v13, 16  ;;  %v1707_v6 = vld [vmem:[#allocation2 + $0x54] ss:$0 sps:$4 sm:$0xff]   ;;  %s1836_s6 = scalar_lea.vmem %s1835_s23, 1024 }
  0x98   : > { %505 = vrot.lane.b32.xlu0 %v479_v60, %s1909_s20  ;;  %v702_v24 = vor.u32 %v700_v9, %v699_v15  ;;  %v671_v26 = vshrl.u32 %v1449_v17, 16  ;;  %572 = vrot.lane.b32.xlu1 %v1678_v10, %s1908_s18  ;;  %v679_v28 = vshrl.u32 %v1450_v11, 16  ;;  %v674_v29 = vshll.u32 %v1449_v17, 16  ;;  %v1706_v8 = vld [vmem:[#allocation2 + $0x64] ss:$0 sps:$4 sm:$0xff]   ;;  %p1838_p9 = scmp.lt.s32.totalorder %s1836_s6, %s1830_s27 }
  0x99   : > { %v1458_v30 = vcombine.low %v598_v18, %v598_v18  ;;  %v1459_v31 = vcombine.high %v598_v18, %v598_v18  ;;  %v686_v32 = vrot.slane %v684_v22, 7  ;;  %v687_v33 = vshll.u32 %v1451_v12, 16  ;;  %v844_v10 = vld [vmem:[#allocation2 + $0x38] sm:$0xf8]  ;;  %v1709_v17 = vld [vmem:[#allocation2 + $0x34] ss:$0 sps:$4 sm:$0xff]  }
  0x9a   : > { %v673_v34 = vrot.slane %v671_v26, 7  ;;  %v1456_v35 = vcombine.low %v597_v27, %v597_v27  ;;  %v1457_v37 = vcombine.high %v597_v27, %v597_v27  ;;  %v703_v38 = vsel %vm2163_vm5, %v1464_v21, %v702_v24  ;;  %v1708_v21 = vld [vmem:[#allocation2 + $0x44] ss:$0 sps:$4 sm:$0xff]   ;;  %p1839_p12 = por %p1838_p9, %p1837_p7 }
  0x9b   : > { %v736_v36 = vshrl.u32 %v1459_v31, 16  ;;  %v1462_v39 = vrot.slane %v666_v25, 11  ;;  %v1463_v42 = vrot.slane %v679_v28, 11  ;;  %v731_v43 = vshrl.u32 %v1458_v30, 16  ;;  %v848_v28 = vld [vmem:[#allocation2 + $0x78] sm:$0xf8] }
  0x9c   : > { %570 = vrot.lane.b32.xlu0 %v1679_v56, %s1908_s18  ;;  %v676_v40 = vor.u32 %v674_v29, %v673_v34  ;;  %v718_v41 = vshrl.u32 %v1456_v35, 16  ;;  %745 = vrot.lane.b32.xlu1 %v664_v14, %s1910_s7  ;;  %v723_v44 = vshrl.u32 %v1457_v37, 16  ;;  %v726_v45 = vshll.u32 %v1457_v37, 16  ;;  %v1711_v29 = vld [vmem:[#allocation2 + $0x74] ss:$0 sps:$4 sm:$0xff]   ;;  %p1840_p1 = pnand %p1839_p12, %p1833_p3 }
  0x9d   : > { %v716_v46 = vsel %vm2163_vm5, %v1465_v20, %v715_v23  ;;  %v689_v47 = vor.u32 %v687_v33, %v686_v32  ;;  %v738_v48 = vrot.slane %v736_v36, 7  ;;  %v739_v49 = vshll.u32 %v1459_v31, 16  ;;  %v845_v20 = vld [vmem:[#allocation2 + $0x48] sm:$0xf8] }
  0x9e   : > { %v725_v51 = vrot.slane %v723_v44, 7  ;;  %v677_v52 = vsel %vm2163_vm5, %v1462_v39, %v676_v40  ;;  %v1466_v53 = vrot.slane %v718_v41, 11  ;;  %v1467_v56 = vrot.slane %v731_v43, 11  ;;  %v849_v37 = vld [vmem:[#allocation2 + $0x88] sm:$0xf8] }
  0x9f   : > { %v690_v55 = vsel %vm2163_vm5, %v1463_v42, %v689_v47  ;;  %v741_v57 = vor.u32 %v739_v49, %v738_v48  ;;  %v1477_v62 = vcombine.high %v842_v58, %v842_v58  ;;  %v1479_v2 = vcombine.high %v843_v61, %v843_v61  ;;  %v1710_v42 = vld [vmem:[#allocation2 + $0x84] ss:$0 sps:$4 sm:$0xff]  }
  0xa0   : > { %743 = vrot.lane.b32.xlu0 %v651_v19, %s1910_s7  ;;  %753 = vrot.lane.b32.xlu1 %v716_v46, %s1910_s7  ;;  %v728_v54 = vor.u32 %v726_v45, %v725_v51  ;;  %v1476_v3 = vcombine.low %v842_v58, %v842_v58  ;;  %v1485_v7 = vcombine.high %v846_v0, %v846_v0 }
  0xa1   : > { %v742_v60 = vsel %vm2163_vm5, %v1467_v56, %v741_v57  ;;  %v896_v4 = vshrl.u32 %v1477_v62, 16  ;;  %v1478_v9 = vcombine.low %v843_v61, %v843_v61  ;;  %v909_v11 = vshrl.u32 %v1479_v2, 16 }
  0xa2   : > { %v729_v59 = vsel %vm2163_vm5, %v1466_v53, %v728_v54  ;;  %v1487_v12 = vcombine.high %v847_v5, %v847_v5  ;;  %v891_v13 = vshrl.u32 %v1476_v3, 16  ;;  %v899_v15 = vshll.u32 %v1477_v62, 16 }
  0xa3   : > { %v898_v14 = vrot.slane %v896_v4, 7  ;;  %v1484_v18 = vcombine.low %v846_v0, %v846_v0  ;;  %v948_v19 = vshrl.u32 %v1485_v7, 16  ;;  %v904_v22 = vshrl.u32 %v1478_v9, 16 }
  0xa4   : > { %751 = vrot.lane.b32.xlu0 %v703_v38, %s1910_s7  ;;  %749 = vrot.lane.b32.xlu1 %v690_v55, %s1910_s7  ;;  %v1486_v23 = vcombine.low %v847_v5, %v847_v5  ;;  %v1481_v24 = vcombine.high %v844_v10, %v844_v10  ;;  %v911_v25 = vrot.slane %v909_v11, 7  ;;  %v912_v26 = vshll.u32 %v1479_v2, 16 }
  0xa5   : > { %v961_v27 = vshrl.u32 %v1487_v12, 16  ;;  %v1492_v30 = vrot.slane %v891_v13, 11  ;;  %v901_v31 = vor.u32 %v899_v15, %v898_v14  ;;  %v1483_v32 = vcombine.high %v845_v20, %v845_v20 }
  0xa6   : > { %v943_v33 = vshrl.u32 %v1484_v18, 16  ;;  %v950_v34 = vrot.slane %v948_v19, 7  ;;  %v951_v35 = vshll.u32 %v1485_v7, 16  ;;  %v1480_v36 = vcombine.low %v844_v10, %v844_v10 }
  0xa7   : > { %v1493_v38 = vrot.slane %v904_v22, 11  ;;  %v956_v39 = vshrl.u32 %v1486_v23, 16  ;;  %v922_v40 = vshrl.u32 %v1481_v24, 16  ;;  %v1489_v41 = vcombine.high %v848_v28, %v848_v28  ;;  %v1730_v23 = vld [vmem:[#allocation2 + $0x1c] ss:$0 sps:$4 sm:$0xff]  }
  0xa8   : > { %747 = vrot.lane.b32.xlu0 %v677_v52, %s1910_s7  ;;  %757 = vrot.lane.b32.xlu1 %v742_v60, %s1910_s7  ;;  %v914_v43 = vor.u32 %v912_v26, %v911_v25  ;;  %v963_v44 = vrot.slane %v961_v27, 7  ;;  %v964_v45 = vshll.u32 %v1487_v12, 16  ;;  %v1482_v46 = vcombine.low %v845_v20, %v845_v20  ;;  %v1737_v20 = vld [vmem:[#allocation7] sm:$0xff]   ;;  %v1729_v25 = vld [vmem:[#allocation2 + $0x2c] ss:$0 sps:$4 sm:$0xff]  }
  0xa9   : > { %v935_v47 = vshrl.u32 %v1483_v32, 16  ;;  %v1491_v48 = vcombine.high %v849_v37, %v849_v37  ;;  %v902_v49 = vsel %vm2163_vm5, %v1492_v30, %v901_v31  ;;  %v1496_v50 = vrot.slane %v943_v33, 11  ;;  %1550 = vmatprep.subr.bf16.mxu0 %v1737_v20  ;;  %1564 = vmatprep.subr.bf16.mxu1 %v1737_v20  ;;  %v1732_v26 = vld [vmem:[#allocation2 + $0x5c] ss:$0 sps:$4 sm:$0xff]   ;;  %v1733_v30 = vld [vmem:[#allocation2 + $0x4c] ss:$0 sps:$4 sm:$0xff]  }
  0xaa   : > { %v953_v51 = vor.u32 %v951_v35, %v950_v34  ;;  %v917_v52 = vshrl.u32 %v1480_v36, 16  ;;  %v924_v53 = vrot.slane %v922_v40, 7  ;;  %v925_v54 = vshll.u32 %v1481_v24, 16  ;;  %1551 = vmatpush3.bf16.msra.mxu0 %v1737_v20  ;;  %v1738_v24 = vld [vmem:[#allocation7 + $0x8] sm:$0xff]   ;;  %1567 = vmatpush3.bf16.msra.mxu1 %v1737_v20 }
  0xab   : > { %v1488_v55 = vcombine.low %v848_v28, %v848_v28  ;;  %v974_v56 = vshrl.u32 %v1489_v41, 16  ;;  %v915_v57 = vsel %vm2163_vm5, %v1493_v38, %v914_v43  ;;  %v1497_v58 = vrot.slane %v956_v39, 11  ;;  %1552 = vmatprep.subr.bf16.mxu0 %v1738_v24  ;;  %1565 = vmatprep.subr.bf16.mxu1 %v1738_v24  ;;  %v1740_v27 = vld [vmem:[#allocation7 + $0x10] ss:$0 sps:$4 sm:$0x33]  }
  0xac   : > { %755 = vrot.lane.b32.xlu0 %v729_v59, %s1910_s7  ;;  %810 = vrot.lane.b32.xlu1 %v1704_v1, %s1911_s8  ;;  %v966_v59 = vor.u32 %v964_v45, %v963_v44  ;;  %v930_v60 = vshrl.u32 %v1482_v46, 16  ;;  %v937_v61 = vrot.slane %v935_v47, 7  ;;  %v938_v62 = vshll.u32 %v1483_v32, 16  ;;  %v1736_v31 = vld [vmem:[#allocation2 + $0x7c] ss:$0 sps:$4 sm:$0xff]  }
  0xad   : > { %v987_v0 = vshrl.u32 %v1491_v48, 16  ;;  %v954_v1 = vsel %vm2163_vm5, %v1496_v50, %v953_v51  ;;  %v1494_v2 = vrot.slane %v917_v52, 11  ;;  %v927_v3 = vor.u32 %v925_v54, %v924_v53  ;;  %v1735_v32 = vld [vmem:[#allocation2 + $0x8c] ss:$0 sps:$4 sm:$0xff]  }
  0xae   : > { %v969_v4 = vshrl.u32 %v1488_v55, 16  ;;  %v976_v5 = vrot.slane %v974_v56, 7  ;;  %v967_v7 = vsel %vm2163_vm5, %v1497_v58, %v966_v59  ;;  %v940_v9 = vor.u32 %v938_v62, %v937_v61  ;;  %1553 = vmatpush3.bf16.msra.mxu0 %v1738_v24  ;;  %1568 = vmatpush3.bf16.msra.mxu1 %v1738_v24 }
  0xaf   : > { %v989_v11 = vrot.slane %v987_v0, 7  ;;  %v990_v12 = vshll.u32 %v1491_v48, 16  ;;  %v928_v13 = vsel %vm2163_vm5, %v1494_v2, %v927_v3  ;;  %1570 = vmatprep.subr.msk.bf16.mxu0 %vm1160_vm6, %v1740_v27  ;;  %v1162_v28 = vsel %vm1160_vm6, %v1740_v27, 0  ;;  %1571 = vmatprep.subr.msk.bf16.mxu1 %vm1160_vm6, %v1740_v27 }
  0xb0   : > { %808 = vrot.lane.b32.xlu0 %v1705_v63, %s1911_s8  ;;  %818 = vrot.lane.b32.xlu1 %v1706_v8, %s1911_s8  ;;  %v1490_v63 = vcombine.low %v849_v37, %v849_v37  ;;  %v1495_v8 = vrot.slane %v930_v60, 11  ;;  %v1498_v14 = vrot.slane %v969_v4, 11 }
  0xb1   : > { %v992_v19 = vor.u32 %v990_v12, %v989_v11 }
  0xb2   : > { %v982_v10 = vshrl.u32 %v1490_v63, 16  ;;  %1555 = vmatpush3.bf16.msra.mxu0 %v1162_v28  ;;  %1569 = vmatpush3.bf16.msra.mxu1 %v1162_v28 }
  0xb4   : > { %816 = vrot.lane.b32.xlu0 %v1707_v6, %s1911_s8  ;;  %814 = vrot.lane.b32.xlu1 %v1708_v21, %s1911_s8  ;;  %v977_v6 = vshll.u32 %v1489_v41, 16  ;;  %v1499_v18 = vrot.slane %v982_v10, 11 }
  0xb6   : > { %v979_v15 = vor.u32 %v977_v6, %v976_v5  ;;  %v993_v22 = vsel %vm2163_vm5, %v1499_v18, %v992_v19 }
  0xb8   : > { %812 = vrot.lane.b32.xlu0 %v1709_v17, %s1911_s8  ;;  %822 = vrot.lane.b32.xlu1 %v1710_v42, %s1911_s8  ;;  %v941_v17 = vsel %vm2163_vm5, %v1495_v8, %v940_v9  ;;  %v980_v21 = vsel %vm2163_vm5, %v1498_v14, %v979_v15 }
  0xbc   : > { %820 = vrot.lane.b32.xlu0 %v1711_v29, %s1911_s8  ;;  %996 = vrot.lane.b32.xlu1 %v915_v57, %s1912_s26  ;;  %v1734_v29 = vld [vmem:[#allocation2 + $0x3c] ss:$0 sps:$4 sm:$0xff]  }
  0xc0   : > { %994 = vrot.lane.b32.xlu0 %v902_v49, %s1912_s26  ;;  %1004 = vrot.lane.b32.xlu1 %v967_v7, %s1912_s26 }
  0xc4   : > { %1002 = vrot.lane.b32.xlu0 %v954_v1, %s1912_s26  ;;  %1000 = vrot.lane.b32.xlu1 %v941_v17, %s1912_s26 }
  0xc8   : > { %998 = vrot.lane.b32.xlu0 %v928_v13, %s1912_s26  ;;  %1008 = vrot.lane.b32.xlu1 %v993_v22, %s1912_s26  ;;  %v1508_v22 = vld [vmem:[#allocation9] ss:$0 sm:$0xff] }
  0xcc   : > { %1006 = vrot.lane.b32.xlu0 %v980_v21, %s1912_s26  ;;  %1061 = vrot.lane.b32.xlu1 %v1729_v25, %s1913_s28 }
  0xd0   : > { %1059 = vrot.lane.b32.xlu0 %v1730_v23, %s1913_s28  ;;  %1069 = vrot.lane.b32.xlu1 %v1731_v16, %s1913_s28 }
  0xd4   : > { %1067 = vrot.lane.b32.xlu0 %v1732_v26, %s1913_s28  ;;  %1065 = vrot.lane.b32.xlu1 %v1733_v30, %s1913_s28 }
  0xd8   : > { %1063 = vrot.lane.b32.xlu0 %v1734_v29, %s1913_s28  ;;  %1073 = vrot.lane.b32.xlu1 %v1735_v32, %s1913_s28 }
  0xdc   : > { %1071 = vrot.lane.b32.xlu0 %v1736_v31, %s1913_s28 }
  0xe4   : > { %v559_v33 = vpop.permute.xlu0 %558 }
  0xee   : > { %v561_v34 = vpop.permute.xlu1 %560 }
  0xf2   : > { %v569_v36 = vpop.permute.xlu1 %568 }
  0xf6   : > { %v494_v35 = vpop.permute.xlu0 %493  ;;  %v565_v38 = vpop.permute.xlu1 %564 }
  0xf7   : > { %518 = vst.msk [vmem:[#allocation3] sm:$0xf] %vm517_vm7, %v494_v35 }
  0xf8   : > { %583 = vst.msk [vmem:[#allocation3] sm:$0xf] %vm582_vm8, %v559_v33 }
  0xfa   : > { %v567_v37 = vpop.permute.xlu0 %566  ;;  %v502_v40 = vpop.permute.xlu1 %501 }
  0xfb   : > { %522 = vst.msk [vmem:[#allocation3 + $0x10] sm:$0xf] %vm517_vm7, %v502_v40 }
  0xfc   : > { %587 = vst.msk [vmem:[#allocation3 + $0x10] sm:$0xf] %vm582_vm8, %v567_v37 }
  0xfe   : > { %v563_v39 = vpop.permute.xlu0 %562  ;;  %v504_v42 = vpop.permute.xlu1 %503 }
  0xff   : > { %523 = vst.msk [vmem:[#allocation3 + $0x14] sm:$0xf] %vm517_vm7, %v504_v42 }
 0x100   : > { %588 = vst.msk [vmem:[#allocation3 + $0x14] sm:$0xf] %vm582_vm8, %v569_v36 }
 0x102   : > { %v496_v41 = vpop.permute.xlu0 %495  ;;  %v500_v44 = vpop.permute.xlu1 %499 }
 0x103   : > { %519 = vst.msk [vmem:[#allocation3 + $0x4] sm:$0xf] %vm517_vm7, %v496_v41  ;;  %521 = vst.msk [vmem:[#allocation3 + $0xc] sm:$0xf] %vm517_vm7, %v500_v44 }
 0x104   : > { %584 = vst.msk [vmem:[#allocation3 + $0x4] sm:$0xf] %vm582_vm8, %v561_v34  ;;  %586 = vst.msk [vmem:[#allocation3 + $0xc] sm:$0xf] %vm582_vm8, %v565_v38 }
 0x106   : > { %v498_v43 = vpop.permute.xlu0 %497  ;;  %v508_v46 = vpop.permute.xlu1 %507 }
 0x107   : > { %520 = vst.msk [vmem:[#allocation3 + $0x8] sm:$0xf] %vm517_vm7, %v498_v43  ;;  %525 = vst.msk [vmem:[#allocation3 + $0x1c] sm:$0xf] %vm517_vm7, %v508_v46 }
 0x108   : > { %585 = vst.msk [vmem:[#allocation3 + $0x8] sm:$0xf] %vm582_vm8, %v563_v39 }
 0x10a   : > { %v506_v45 = vpop.permute.xlu0 %505  ;;  %v573_v48 = vpop.permute.xlu1 %572 }
 0x10b   : > { %524 = vst.msk [vmem:[#allocation3 + $0x18] sm:$0xf] %vm517_vm7, %v506_v45 }
 0x10c   : > { %590 = vst.msk [vmem:[#allocation3 + $0x1c] sm:$0xf] %vm582_vm8, %v573_v48 }
 0x10e   : > { %v571_v47 = vpop.permute.xlu0 %570  ;;  %v746_v50 = vpop.permute.xlu1 %745 }
 0x10f   : > { %589 = vst.msk [vmem:[#allocation3 + $0x18] sm:$0xf] %vm582_vm8, %v571_v47 }
 0x110   : > { %769 = vst.msk [vmem:[#allocation3 + $0x4] sm:$0xf] %vm767_vm9, %v746_v50 }
 0x112   : > { %v744_v49 = vpop.permute.xlu0 %743  ;;  %v754_v52 = vpop.permute.xlu1 %753 }
 0x113   : > { %768 = vst.msk [vmem:[#allocation3] sm:$0xf] %vm767_vm9, %v744_v49  ;;  %773 = vst.msk [vmem:[#allocation3 + $0x14] sm:$0xf] %vm767_vm9, %v754_v52 }
 0x116   : > { %v752_v51 = vpop.permute.xlu0 %751  ;;  %v750_v54 = vpop.permute.xlu1 %749 }
 0x117   : > { %772 = vst.msk [vmem:[#allocation3 + $0x10] sm:$0xf] %vm767_vm9, %v752_v51  ;;  %771 = vst.msk [vmem:[#allocation3 + $0xc] sm:$0xf] %vm767_vm9, %v750_v54 }
 0x11a   : > { %v748_v53 = vpop.permute.xlu0 %747  ;;  %v758_v56 = vpop.permute.xlu1 %757 }
 0x11b   : > { %770 = vst.msk [vmem:[#allocation3 + $0x8] sm:$0xf] %vm767_vm9, %v748_v53  ;;  %775 = vst.msk [vmem:[#allocation3 + $0x1c] sm:$0xf] %vm767_vm9, %v758_v56 }
 0x11e   : > { %v756_v55 = vpop.permute.xlu0 %755  ;;  %v811_v58 = vpop.permute.xlu1 %810 }
 0x11f   : > { %774 = vst.msk [vmem:[#allocation3 + $0x18] sm:$0xf] %vm767_vm9, %v756_v55 }
 0x120   : > { %834 = vst.msk [vmem:[#allocation3 + $0x4] sm:$0xf] %vm832_vm10, %v811_v58 }
 0x122   : > { %v809_v57 = vpop.permute.xlu0 %808  ;;  %v819_v60 = vpop.permute.xlu1 %818 }
 0x123   : > { %833 = vst.msk [vmem:[#allocation3] sm:$0xf] %vm832_vm10, %v809_v57  ;;  %838 = vst.msk [vmem:[#allocation3 + $0x14] sm:$0xf] %vm832_vm10, %v819_v60 }
 0x126   : > { %v817_v59 = vpop.permute.xlu0 %816  ;;  %v815_v62 = vpop.permute.xlu1 %814 }
 0x127   : > { %837 = vst.msk [vmem:[#allocation3 + $0x10] sm:$0xf] %vm832_vm10, %v817_v59  ;;  %836 = vst.msk [vmem:[#allocation3 + $0xc] sm:$0xf] %vm832_vm10, %v815_v62 }
 0x12a   : > { %v813_v61 = vpop.permute.xlu0 %812  ;;  %v823_v0 = vpop.permute.xlu1 %822 }
 0x12b   : > { %835 = vst.msk [vmem:[#allocation3 + $0x8] sm:$0xf] %vm832_vm10, %v813_v61  ;;  %840 = vst.msk [vmem:[#allocation3 + $0x1c] sm:$0xf] %vm832_vm10, %v823_v0 }
 0x12e   : > { %v821_v63 = vpop.permute.xlu0 %820  ;;  %v997_v2 = vpop.permute.xlu1 %996 }
 0x12f   : > { %839 = vst.msk [vmem:[#allocation3 + $0x18] sm:$0xf] %vm832_vm10, %v821_v63 }
 0x130   : > { %1020 = vst.msk [vmem:[#allocation3 + $0x4] sm:$0xf] %vm1018_vm11, %v997_v2 }
 0x132   : > { %v995_v1 = vpop.permute.xlu0 %994  ;;  %v1005_v4 = vpop.permute.xlu1 %1004 }
 0x133   : > { %1019 = vst.msk [vmem:[#allocation3] sm:$0xf] %vm1018_vm11, %v995_v1  ;;  %1024 = vst.msk [vmem:[#allocation3 + $0x14] sm:$0xf] %vm1018_vm11, %v1005_v4 }
 0x136   : > { %v1003_v3 = vpop.permute.xlu0 %1002  ;;  %v1001_v6 = vpop.permute.xlu1 %1000 }
 0x137   : > { %1023 = vst.msk [vmem:[#allocation3 + $0x10] sm:$0xf] %vm1018_vm11, %v1003_v3  ;;  %1022 = vst.msk [vmem:[#allocation3 + $0xc] sm:$0xf] %vm1018_vm11, %v1001_v6 }
 0x13a   : > { %v999_v5 = vpop.permute.xlu0 %998  ;;  %v1009_v8 = vpop.permute.xlu1 %1008 }
 0x13b   : > { %1021 = vst.msk [vmem:[#allocation3 + $0x8] sm:$0xf] %vm1018_vm11, %v999_v5  ;;  %1026 = vst.msk [vmem:[#allocation3 + $0x1c] sm:$0xf] %vm1018_vm11, %v1009_v8 }
 0x13e   : > { %v1007_v7 = vpop.permute.xlu0 %1006  ;;  %v1062_v10 = vpop.permute.xlu1 %1061 }
 0x13f   : > { %1025 = vst.msk [vmem:[#allocation3 + $0x18] sm:$0xf] %vm1018_vm11, %v1007_v7 }
 0x140   : > { %1085 = vst.msk [vmem:[#allocation3 + $0x4] sm:$0xf] %vm1083_vm12, %v1062_v10 }
 0x142   : > { %v1060_v9 = vpop.permute.xlu0 %1059  ;;  %v1070_v12 = vpop.permute.xlu1 %1069 }
 0x143   : > { %1084 = vst.msk [vmem:[#allocation3] sm:$0xf] %vm1083_vm12, %v1060_v9  ;;  %1089 = vst.msk [vmem:[#allocation3 + $0x14] sm:$0xf] %vm1083_vm12, %v1070_v12 }
 0x146   : > { %v1068_v11 = vpop.permute.xlu0 %1067  ;;  %v1066_v14 = vpop.permute.xlu1 %1065 }
 0x147   : > { %1088 = vst.msk [vmem:[#allocation3 + $0x10] sm:$0xf] %vm1083_vm12, %v1068_v11  ;;  %1087 = vst.msk [vmem:[#allocation3 + $0xc] sm:$0xf] %vm1083_vm12, %v1066_v14 }
 0x14a   : > { %v1064_v13 = vpop.permute.xlu0 %1063  ;;  %v1739_v15 = vld [vmem:[#allocation3] sm:$0xff]   ;;  %v1074_v18 = vpop.permute.xlu1 %1073 }
 0x14b   : > { %1086 = vst.msk [vmem:[#allocation3 + $0x8] sm:$0xf] %vm1083_vm12, %v1064_v13  ;;  %1556 = vmatprep.mubr.msk.bf16.mxu0 %vm1147_vm13, %v1739_v15  ;;  %1091 = vst.msk [vmem:[#allocation3 + $0x1c] sm:$0xf] %vm1083_vm12, %v1074_v18 }
 0x14e   : > { %v1072_v17 = vpop.permute.xlu0 %1071  ;;  %v1741_v19 = vld [vmem:[#allocation3 + $0x10] sm:$0xff]  }
 0x14f   : > { %1090 = vst.msk [vmem:[#allocation3 + $0x18] sm:$0xf] %vm1083_vm12, %v1072_v17  ;;  %1560 = vmatprep.mubr.msk.bf16.mxu1 %vm1147_vm13, %v1741_v19 }
 0x152   : > { %v1742_v20 = vld [vmem:[#allocation3 + $0x8] sm:$0xff]  }
 0x153   : > { %1557 = vmatmul.mubr.msk.bf16.vlgmr.msra.gmra.mrb[0].mxu0 %vm1147_vm13, %v1742_v20 }
 0x156   : > { %v1743_v21 = vld [vmem:[#allocation3 + $0x18] sm:$0xff]  }
 0x157   : > { %1561 = vmatmul.mubr.msk.bf16.vlgmr.msra.gmra.mrb[0].mxu1 %vm1147_vm13, %v1743_v21 }
 0x226   : > { %v1558_v23 = vpop.f32.mrb[0].mxu0 }
 0x227   : > { %v1207_v24 = vadd.f32 %v1558_v23, %v1508_v22  ;;  %v1198_v25 = vpop.f32.mrb[1].mxu0 }
 0x228   : > { %v1199_v26 = vadd.f32 %v1508_v22, %v1198_v25  ;;  %v1559_v27 = vpop.f32.mrb[2].mxu0 }
 0x229   : > { %v1231_v16 = vmax.f32 %v1207_v24, 0.0  ;;  %v1210_v28 = vadd.f32 %v1559_v27, %v1508_v22  ;;  %v1201_v29 = vpop.f32.mrb[3].mxu0 }
 0x22a   : > { %v1229_v30 = vmax.f32 %v1199_v26, 0.0  ;;  %v1202_v31 = vadd.f32 %v1508_v22, %v1201_v29  ;;  %v1562_v32 = vpop.f32.mrb[0].mxu1 }
 0x22b   : > { %v1536_v33 = vpack.c.bf16 %v1231_v16, %v1231_v16  ;;  %v1232_v34 = vmax.f32 %v1210_v28, 0.0  ;;  %v1223_v35 = vadd.f32 %v1562_v32, %v1508_v22  ;;  %v1214_v36 = vpop.f32.mrb[1].mxu1 }
 0x22c   : > { %v1534_v37 = vpack.c.bf16 %v1229_v30, %v1229_v30  ;;  %v1230_v38 = vmax.f32 %v1202_v31, 0.0  ;;  %v1215_v39 = vadd.f32 %v1508_v22, %v1214_v36  ;;  %v1563_v40 = vpop.f32.mrb[2].mxu1 }
 0x22d   : > { %1271 = vst.msk [vmem:[%s215_s29 + $0x8] sm:$0xf] %vm220_vm1, %v1536_v33  ;;  %v1537_v41 = vpack.c.bf16 %v1232_v34, %v1232_v34  ;;  %v1235_v42 = vmax.f32 %v1223_v35, 0.0  ;;  %v1226_v43 = vadd.f32 %v1563_v40, %v1508_v22  ;;  %v1217_v44 = vpop.f32.mrb[3].mxu1 }
 0x22e   : > { %1269 = vst.msk [vmem:[%s215_s29] sm:$0xf] %vm220_vm1, %v1534_v37  ;;  %v1535_v45 = vpack.c.bf16 %v1230_v38, %v1230_v38  ;;  %v1233_v46 = vmax.f32 %v1215_v39, 0.0  ;;  %v1218_v47 = vadd.f32 %v1508_v22, %v1217_v44 }
 0x22f   : > { %1272 = vst.msk [vmem:[%s215_s29 + $0xc] sm:$0xf] %vm220_vm1, %v1537_v41  ;;  %v1540_v48 = vpack.c.bf16 %v1235_v42, %v1235_v42  ;;  %v1236_v49 = vmax.f32 %v1226_v43, 0.0 }
 0x230   : > { %1270 = vst.msk [vmem:[%s215_s29 + $0x4] sm:$0xf] %vm220_vm1, %v1535_v45  ;;  %v1538_v50 = vpack.c.bf16 %v1233_v46, %v1233_v46  ;;  %v1234_v51 = vmax.f32 %v1218_v47, 0.0 }
 0x231   : > { %1275 = vst.msk [vmem:[%s215_s29 + $0x18] sm:$0xf] %vm220_vm1, %v1540_v48  ;;  %v1541_v52 = vpack.c.bf16 %v1236_v49, %v1236_v49 }
 0x232   : > { %1273 = vst.msk [vmem:[%s215_s29 + $0x10] sm:$0xf] %vm220_vm1, %v1538_v50  ;;  %v1539_v53 = vpack.c.bf16 %v1234_v51, %v1234_v51 }
 0x233   : > { %1276 = vst.msk [vmem:[%s215_s29 + $0x1c] sm:$0xf] %vm220_vm1, %v1541_v52 }
 0x234   : > { %1274 = vst.msk [vmem:[%s215_s29 + $0x14] sm:$0xf] %vm220_vm1, %v1539_v53 }
 0x235   : > { %1843 = shalt.err (!%p1840_p1)
}
 0x236   : > { %s1844_s20 = scalar_lea.hbm %s2330_s24, 512  ;;  %s1848_s26 = scalar_lea.hbm %s2383_s3, 1024 }
 0x237   : > { %p1845_p13 = scmp.ne.s32.totalorder %s2330_s24, %s1844_s20  ;;  %p1849_p4 = scmp.lt.u32.totalorder %s2330_s24, %s2383_s3 }
 0x238   : > { %p1850_p5 = scmp.lt.u32.totalorder %s1848_s26, %s1844_s20  ;;  %p1852_p11 = scmp.lt.u32.totalorder %s1844_s20, %s2330_s24 }
 0x239   : > { %p1846_p6 = pnand %p1845_p13, %p2399_p0 }
 0x23a   : > { %p1851_p8 = por %p1850_p5, %p1849_p4 }
 0x23b   : > { %p1847_p10 = pneg %p1846_p6 }
 0x23c   : > { %p1853_p2 = por %p1852_p11, %p1851_p8 }
 0x23e   : > { %p1854_p3 = pnand %p1853_p2, %p1847_p10 }
 0x240   : > { %1857 = shalt.err (!%p1854_p3)
}
 0x241   : > { %s1915_s29 = smov 64  }
 0x242   : > { %1582 = dma.vmem_to_hbm [thread:$0]  (%p2399_p0), %s2333_s25, 512, %s2330_s24, %s1278_s16, %s1915_s29, %s1915_s29, %s1908_s18  }
 0x243 PF: > { %s1306_s17 = sand.u32 1, %s1888_s12   ;;  %p2400_p7 = scmp.ne.s32.totalorder %s2388_s19, 0 }
 0x244   : > { %p2401_p9 = scmp.ge.s32.totalorder %s1900_s15, 2  ;;  %s1307_s11 = scalar_lea.sflag [#allocation6], %s1306_s17 }
 0x246   : > { %p1596_p12 = pnand %p2401_p9, %p2400_p7 }
 0x248   : > { %1883 = dma.done.wait (!%p1596_p12), %s1307_s11, 512  }
 0x249   : > { %1885 = vsyncadd (!%p1596_p12), %s1307_s11, 4294966784  ;;  %p17_p1 = scmp.ge.s32.totalorder %s2050_s5, 4   ;;  %s2402_s12 = smov %s1892_s13 }
 0x24a   : > { %s2403_s13 = smov %s1896_s14  ;;  %s2404_s14 = smov %s2066_s10 }
 0x24b   : > { %s2405_s15 = smov %s2050_s5  ;;  %19 = sbr.rel (!%p17_p1) target bundleno = 6 (0x6), region = 88 }
 0x252   :  { %1312 = vsyncpa [#allocation5], 1 }
 0x253   :  { %1314 = vsyncpa [#allocation5 + $0x1], 1 }
 0x254   :  { %1315 = vsyncpa [#allocation8], 1 }
 0x255   :  { %1316 = vsyncpa [#allocation6], 1 }
 0x256   :  { %1318 = vsyncpa [#allocation6 + $0x1], 1 }

</bundles_post_ra>
